<compile_context>
chip_gen: v5e
topology: v5e:2x2
jax: 0.10.0
libtpu: 0.0.40
codegen_flags: <defaults>
</compile_context>

<pallas_src>
import jax
import jax.numpy as jnp
from jax.experimental import pallas as pl
from jax.experimental.pallas import tpu as pltpu


def _lrn_kernel(x_ref, band_ref, o_ref):
    # x_ref block: (B_blk, C_pad, T); band_ref: (C_pad, C_pad) banded matrix whose
    # non-zero entries are alpha = 1e-4 (|c - d| <= 2).
    band = band_ref[...]
    b_blk = x_ref.shape[0]
    for b in range(b_blk):                      # static, short unrolled loop
        x = x_ref[b]                            # (C_pad, T)
        # Cross-channel 5-tap window sum (scaled by alpha) on the MXU.
        acc = jnp.dot(band, x * x,
                      preferred_element_type=jnp.float32,
                      precision=jax.lax.Precision.HIGHEST)
        t = 2.0 + acc
        # t ** -0.75 == rsqrt(t) * sqrt(rsqrt(t))  (EUP path, no pow/divide).
        r = jax.lax.rsqrt(t)
        o_ref[b] = (x * (r * jnp.sqrt(r))).astype(o_ref.dtype)


def lrn(x, *, target_block_bytes=2 * 1024 * 1024):
    """x: (N, C, H, W) float32 -> (N, C, H, W), matching MDNet's LRN module."""
    N, C, H, W = x.shape
    HW = H * W
    dtype_bytes = jnp.dtype(x.dtype).itemsize

    # Sublane-align channels only if needed (MDNet's 96 / 256 never need it).
    C_pad = ((C + 7) // 8) * 8
    x_flat = x.reshape(N, C, HW)                # free: contiguous reshape
    if C_pad != C:
        x_flat = jnp.pad(x_flat, ((0, 0), (0, C_pad - C), (0, 0)))

    hw_128 = ((HW + 127) // 128) * 128

    # Lane tile: whole 128-rounded row when it fits the per-block byte budget,
    # otherwise the largest multiple of 128 that does.  No wrapper-side HW padding:
    # the grid uses cdiv and Pallas masks the tail block's out-of-bounds lanes.
    max_t = max(128, (target_block_bytes // (C_pad * dtype_bytes)) // 128 * 128)
    T = min(hw_128, max_t)

    # Batch packing: put several images/RoIs in one grid step when the per-image
    # block is small (conv2's 11x11 case), amortizing the fixed per-step overhead.
    row_bytes = C_pad * T * dtype_bytes
    B_blk = int(max(1, min(N, 8, target_block_bytes // row_bytes)))

    n_b = pl.cdiv(N, B_blk)
    n_hw = pl.cdiv(HW, T)

    # v7x has 2 TensorCores: keep >= 2 parallel grid steps when there is enough work.
    if n_b * n_hw < 2:
        if N >= 2:
            B_blk = (N + 1) // 2
            n_b = pl.cdiv(N, B_blk)
        elif hw_128 >= 256:
            T = ((hw_128 // 2 + 127) // 128) * 128
            n_hw = pl.cdiv(HW, T)

    # Static banded matrix with alpha folded in: band[c, d] = 1e-4 iff |c - d| <= 2.
    # Padded channels hold zeros in x, so they add nothing to real channels' sums.
    idx = jnp.arange(C_pad)
    band = jnp.where(jnp.abs(idx[:, None] - idx[None, :]) <= 2,
                     jnp.asarray(1e-4, x.dtype), jnp.asarray(0.0, x.dtype))

    out_flat = pl.pallas_call(
        _lrn_kernel,
        out_shape=jax.ShapeDtypeStruct((N, C_pad, HW), x.dtype),
        grid_spec=pltpu.PrefetchScalarGridSpec(
            num_scalar_prefetch=0,
            grid=(n_b, n_hw),
            in_specs=[
                pl.BlockSpec((B_blk, C_pad, T), lambda b, t: (b, 0, t)),
                # Constant block index -> fetched once, reused across all grid steps.
                pl.BlockSpec((C_pad, C_pad), lambda b, t: (0, 0)),
            ],
            out_specs=pl.BlockSpec((B_blk, C_pad, T), lambda b, t: (b, 0, t)),
        ),
        compiler_params=pltpu.CompilerParams(
            dimension_semantics=("parallel", "parallel"),
        ),
    )(x_flat, band)

    if C_pad != C:
        out_flat = out_flat[:, :C, :]
    return out_flat.reshape(N, C, H, W)


def _lrn_ref(x):
    # Pure-JAX reference mirroring the PyTorch LRN forward (raw 5-window sum).
    xs = x ** 2
    C = x.shape[1]
    acc = jnp.zeros_like(xs)
    for off in range(-2, 3):
        lo = max(0, -off)
        hi = min(C, C - off)
        acc = acc.at[:, lo:hi].add(xs[:, lo + off:hi + off])
    return x / (2.0 + 0.0001 * acc) ** 0.75


if __name__ == "__main__":
    k0, k1, k2 = jax.random.split(jax.random.PRNGKey(0), 3)

    # Small shape consistent with the module's NCHW inputs (channel-pad path).
    x = jax.random.normal(k0, (2, 4, 16, 16), dtype=jnp.float32)
    out = lrn(x)
    jax.block_until_ready(out)
    assert out.shape == x.shape and out.dtype == x.dtype
    assert jnp.allclose(out, _lrn_ref(x), atol=1e-5, rtol=1e-4)

    # conv1-like shape (96 channels, 51x51 spatial): exercises the ragged HW tail
    # block and the 2-way HW split for single-image calls.
    x2 = jax.random.normal(k1, (1, 96, 51, 51), dtype=jnp.float32)
    out2 = lrn(x2)
    jax.block_until_ready(out2)
    assert out2.shape == x2.shape
    assert jnp.allclose(out2, _lrn_ref(x2), atol=1e-5, rtol=1e-4)

    # conv2-like shape (256 channels, 11x11 spatial, several RoIs): exercises batch
    # packing and the T > HW (128 > 121) masked lane tail.
    x3 = jax.random.normal(k2, (8, 256, 11, 11), dtype=jnp.float32)
    out3 = lrn(x3)
    jax.block_until_ready(out3)
    assert out3.shape == x3.shape
    assert jnp.allclose(out3, _lrn_ref(x3), atol=1e-5, rtol=1e-4)

    print("KERNEL_OK")
</pallas_src>

<mosaic_0001>
module attributes {stable_mosaic.version = 11 : i64} {
  func.func @_lrn_kernel(%arg0: i32, %arg1: i32, %arg2: memref<1x8x256xf32, #tpu.memory_space<vmem>>, %arg3: memref<8x8xf32, #tpu.memory_space<vmem>>, %arg4: memref<1x8x256xf32, #tpu.memory_space<vmem>>) attributes {dimension_semantics = [#tpu.dimension_semantics<parallel>, #tpu.dimension_semantics<parallel>], iteration_bounds = array<i64: 2, 1>, scalar_prefetch = 0 : i64, scratch_operands = 0 : i64, tpu.core_type = #tpu.core_type<tc>, window_params = [{transform_indices = @transform_0, window_bounds = array<i64: 1, 8, 256>}, {pipeline_mode = #tpu.pipeline_mode<synchronous>, transform_indices = @transform_1, window_bounds = array<i64: 8, 8>}, {transform_indices = @transform_2, window_bounds = array<i64: 1, 8, 256>}]} {
    %c0 = arith.constant 0 : index
    %c0_0 = arith.constant 0 : index
    %0 = vector.load %arg3[%c0, %c0_0] : memref<8x8xf32, #tpu.memory_space<vmem>>, vector<8x8xf32>
    %c0_1 = arith.constant 0 : index
    %c0_2 = arith.constant 0 : index
    %c0_3 = arith.constant 0 : index
    %1 = vector.load %arg2[%c0_1, %c0_2, %c0_3] : memref<1x8x256xf32, #tpu.memory_space<vmem>>, vector<1x8x256xf32>
    %2 = vector.shape_cast %1 : vector<1x8x256xf32> to vector<8x256xf32>
    %3 = arith.mulf %2, %2 : vector<8x256xf32>
    %cst = arith.constant dense<0.000000e+00> : vector<8x256xf32>
    %4 = tpu.matmul %0, %3, %cst {dimension_numbers = #tpu.dot_dimension_numbers<[1], [0], [0], [1], [0, 0, 1, 1], [], []>, precision = #tpu.contract_precision<fp32>} : vector<8x8xf32>, vector<8x256xf32>, vector<8x256xf32> -> vector<8x256xf32>
    %cst_4 = arith.constant 2.000000e+00 : f32
    %5 = vector.broadcast %cst_4 : f32 to vector<8x256xf32>
    %6 = arith.addf %5, %4 : vector<8x256xf32>
    %7 = math.rsqrt %6 : vector<8x256xf32>
    %8 = math.sqrt %7 : vector<8x256xf32>
    %9 = arith.mulf %7, %8 : vector<8x256xf32>
    %10 = arith.mulf %2, %9 : vector<8x256xf32>
    %c0_5 = arith.constant 0 : index
    %c0_6 = arith.constant 0 : index
    %c0_7 = arith.constant 0 : index
    %11 = vector.load %arg4[%c0_5, %c0_6, %c0_7] : memref<1x8x256xf32, #tpu.memory_space<vmem>>, vector<1x8x256xf32>
    %12 = vector.shape_cast %11 : vector<1x8x256xf32> to vector<8x256xf32>
    %13 = vector.shape_cast %10 : vector<8x256xf32> to vector<1x8x256xf32>
    tpu.vector_store %arg4[%c0_5, %c0_6, %c0_7], %13 {strides = array<i32>} : memref<1x8x256xf32, #tpu.memory_space<vmem>>, vector<1x8x256xf32>,
    return
  }
  func.func @transform_0(%arg0: i32, %arg1: i32) -> (i32, i32, i32) {
    %c0_i32 = arith.constant 0 : i32
    %c0_i32_0 = arith.constant 0 : i32
    return %arg0, %c0_i32, %arg1 : i32, i32, i32
  }
  func.func @transform_1(%arg0: i32, %arg1: i32) -> (i32, i32) {
    %c0_i32 = arith.constant 0 : i32
    %c0_i32_0 = arith.constant 0 : i32
    %c0_i32_1 = arith.constant 0 : i32
    return %c0_i32, %c0_i32_0 : i32, i32
  }
  func.func @transform_2(%arg0: i32, %arg1: i32) -> (i32, i32, i32) {
    %c0_i32 = arith.constant 0 : i32
    %c0_i32_0 = arith.constant 0 : i32
    return %arg0, %c0_i32, %arg1 : i32, i32, i32
  }
}

</mosaic_0001>

<bundles_post_ra>
// kernel: tpu_custom_call.1
= control target key start
LH: loop header
LB: loop body
LE: loop exit
PB: predicated region body
PF: predicated region fallthrough
CT: control target
= control target key end

     0   :  { %7 = vsyncpa [#allocation3], 0  ;;  %s1088_s0 = inlined_call_operand.hbm [shape: f32[2,8,256], index: 0, kind: input, shape index: {}]   ;;  %s1089_s1 = inlined_call_operand.hbm [shape: f32[8,8], index: 1, kind: input, shape index: {}]   ;;  %s1090_s2 = inlined_call_operand.hbm [shape: f32[2,8,256], index: 2, kind: output, shape index: {}]  }
   0x1   :  { %9 = vsyncpa [#allocation3 + $0x1], 0 }
   0x2   :  { %10 = vsyncpa [#allocation6], 0 }
   0x3   :  { %11 = vsyncpa [#allocation4], 0 }
   0x4   :  { %13 = vsyncpa [#allocation4 + $0x1], 0  ;;  %s925_s9 = smov 0   ;;  %s927_s10 = smov 0  }
   0x5   :  { %s929_s11 = smov 0   ;;  %s931_s12 = smov 0  }
   0x6   :  { %s933_s13 = smov 0   ;;  %s935_s14 = smov 0  }
   0x7 LB: > { %s661_s15 = sadd.s32 4294967295, %s907_s14   ;;  %s662_s16 = sadd.s32 4294967294, %s907_s14   ;;  %s907_s14 = sphi %s935_s14, %s19_s14   ;;  %s903_s13 = sphi %s933_s13, %s1102_s13   ;;  %s899_s12 = sphi %s931_s12, %s1101_s12   ;;  %s895_s11 = sphi %s929_s11, %s1100_s11   ;;  %s891_s10 = sphi %s927_s10, %s1099_s10   ;;  %s887_s9 = sphi %s925_s9, %s1098_s9  }
   0x8   : > { %p53_p0 = scmp.ne.s32.totalorder %s891_s10, %s887_s9  ;;  %p959_p1 = scmp.eq.s32.totalorder %s661_s15, 0 }
   0x9   : > { %p963_p2 = scmp.eq.s32.totalorder %s661_s15, 1  ;;  %p106_p3 = scmp.eq.s32.totalorder %s662_s16, 1 }
   0xa   : > { %p969_p4 = por %p959_p1, %p53_p0  ;;  %p663_p5 = scmp.ge.s32.totalorder %s907_s14, 1 }
   0xb   : > { %p974_p6 = por %p106_p3, %p53_p0  ;;  %p113_p7 = scmp.lt.s32.totalorder %s907_s14, 3 }
   0xc   : > { %s125_s23 = sshll.u32 %s1089_s1, 4  ;;  %p665_p9 = scmp.ge.s32.totalorder %s907_s14, 2  ;;  %s126_s23 = int_to_ptr.hbm [resolvable:$true] %s125_s23 }
   0xd   : > { %p982_p8 = pnand %p663_p5, %p113_p7  ;;  %s909_s25 = smov [#allocation5]  }
   0xe   : > { %s127_s26 = sshll.u32 %s909_s25, 4  ;;  %s31_s27 = sadd.s32 1, %s903_s13  ;;  %s128_s26 = int_to_ptr.vmem [resolvable:$true] %s127_s26 }
   0xf   : > { %p688_p10 = pneg %p982_p8  ;;  %p33_p12 = scmp.ge.s32.totalorder %s31_s27, 2 }
  0x10   : > { %s40_s28 = sadd.s32 1, %s895_s11  ;;  %p47_p13 = scmp.ne.s32.totalorder %s895_s11, %s891_s10 }
  0x11   : > { %p689_p11 = pnand %p688_p10, %p959_p1  ;;  %p48_p0 = scmp.eq.s32.totalorder %s907_s14, 0 }
  0x12   : > { %s1104_s27 = smov (%p33_p12, %s31_s27), 0  ;;  %p1004_p5 = por %p963_p2, %p47_p13 }
  0x13   : > { %691 = dma.hbm_to_vmem [thread:$0]  (!%p689_p11), %s126_s23, 128, %s128_s26, [#allocation6]  }
  0x14   : > { %p998_p3 = por %p48_p0, %p47_p13  ;;  %s35_s3 = ssub.s32 %s903_s13, %s1104_s27 }
  0x15   : > { %p701_p7 = scmp.lt.s32.totalorder %s907_s14, 2  ;;  %p38_p10 = scmp.eq.s32.totalorder %s35_s3, 0 }
  0x16   : > { %s138_s4 = sand.u32 1, %s895_s11   ;;  %s678_s7 = sshll.u32 %s903_s13, 4 }
  0x17   : > { %s666_s5 = sshll.u32 %s138_s4, 4  ;;  %s149_s16 = scalar_lea.hbm %s1088_s0, %s678_s7 }
  0x18   : > { %s1013_s6 = scalar_select %p38_p10, %s895_s11, %s40_s28  }
  0x19   : > { %s142_s21 = scalar_lea.vmem [#allocation2], %s666_s5  ;;  %s151_s18 = sshll.u32 %s149_s16, 4  ;;  %s152_s18 = int_to_ptr.hbm [resolvable:$true] %s151_s18 }
  0x1a   : > { %s153_s22 = sshll.u32 %s142_s21, 4  ;;  %p693_p2 = pnand %p701_p7, %p998_p3  ;;  %s154_s22 = int_to_ptr.vmem [resolvable:$true] %s153_s22 }
  0x1b   : > { %s139_s23 = scalar_lea.sflag [#allocation3], %s138_s4  ;;  %162 = sbr.rel (%p982_p8) target bundleno = 244 (0xf4), region = 28 }
  0x1c   : > { %695 = dma.hbm_to_vmem [thread:$0]  (!%p693_p2), %s152_s18, 256, %s154_s22, %s139_s23  }
  0x1d   : > { %s1024_s25 = sand.u32 (!%p982_p8), 1, %s891_s10  }
  0x1e   : > { %s670_s26 = sshll.u32 (!%p982_p8), %s1024_s25, 4  ;;  %s165_s28 = scalar_lea.sflag (!%p982_p8), [#allocation3], %s1024_s25 }
  0x1f   : > { %s168_s3 = scalar_lea.vmem (!%p982_p8), [#allocation2], %s670_s26 }
  0x20   : > { %874 = dma.done.wait (%p969_p4), %s165_s28, 256  }
  0x21   : > { %876 = vsyncadd (%p969_p4), %s165_s28, 4294967040 }
  0x22   : > { %878 = dma.done.wait (%p959_p1), [#allocation6], 128  }
  0x23   : > { %880 = vsyncadd (%p959_p1), [#allocation6], 4294967168  ;;  %vm202_vm0 = vcmask 64512   ;;  %v1038_v0 = vld [vmem:[%s168_s3] sm:$0xff]  ;;  %v1040_v2 = vld [vmem:[%s168_s3 + $0x8] sm:$0xff]  ;;  %s194_s17 = scalar_lea.vmem [#allocation7], %s670_s26 }
  0x24   : > { %v197_v1 = vld [vmem:[#allocation5] sm:$0xff]  ;;  %v200_v3 = vmul.f32 %v1038_v0, %v1038_v0  ;;  %v201_v5 = vmul.f32 %v1040_v2, %v1040_v2  ;;  %s679_s19 = sshll.u32 %s899_s12, 4  ;;  %s564_s5 = sshll.u32 %s194_s17, 4  ;;  %s565_s5 = int_to_ptr.vmem [resolvable:$true] %s564_s5 }
  0x25   : > { %v204_v4 = vsel %vm202_vm0, %v197_v1, 0  ;;  %s562_s4 = scalar_lea.hbm %s1090_s2, %s679_s19  ;;  %s549_s12 = scalar_lea.sflag [#allocation4], %s1024_s25 }
  0x26   : > { %v223_v6 = vand.u32 4294901760, %v204_v4  ;;  %v221_v7 = vand.u32 4294901760, %v200_v3  ;;  %v367_v8 = vand.u32 4294901760, %v201_v5  ;;  %s566_s7 = sshll.u32 %s562_s4, 4  ;;  %s841_s22 = scalar_lea.hbm %s1090_s2, 32  ;;  %s567_s7 = int_to_ptr.hbm [resolvable:$true] %s566_s7 }
  0x27   : > { %s835_s8 = sshra.s32 %s567_s7, 4  ;;  %s836_s8 = int_to_ptr.hbm [resolvable:$true] %s835_s8 }
  0x28   : > { %v224_v9 = vsub.f32 %v204_v4, %v223_v6  ;;  %v248_v10 = vsub.f32 %v200_v3, %v221_v7  ;;  %222 = vmatpush.msra.mxu0 %v221_v7  ;;  %298 = vmatpush.msra.mxu3 %v221_v7  ;;  %v394_v11 = vsub.f32 %v201_v5, %v367_v8  ;;  %s837_s15 = scalar_lea.hbm %s836_s8, 16  ;;  %p842_p11 = scmp.lt.s32.totalorder %s836_s8, %s1090_s2 }
  0x29   : > { %p838_p1 = scmp.ne.s32.totalorder %s836_s8, %s837_s15  ;;  %p843_p12 = scmp.lt.s32.totalorder %s841_s22, %s837_s15 }
  0x2a   : > { %v225_v12 = vand.u32 4294901760, %v224_v9  ;;  %275 = vmatpush.msra.mxu2 %v248_v10  ;;  %v249_v13 = vand.u32 4294901760, %v248_v10  ;;  %v395_v14 = vand.u32 4294901760, %v394_v11 }
  0x2b   : > { %278 = vmatmul.f32.vlgmr.msra.gmra.mxu2 %v224_v9  ;;  %p839_p4 = pnand %p838_p1, %p1004_p5  ;;  %p844_p13 = por %p843_p12, %p842_p11 }
  0x2c   : > { %v226_v15 = vsub.f32 %v224_v9, %v225_v12  ;;  %302 = vmatmul.f32.vlgmr.msra.gmra.mxu3 %v225_v12  ;;  %368 = vmatpush.msrb.mxu2 %v367_v8  ;;  %v250_v16 = vsub.f32 %v248_v10, %v249_v13  ;;  %v396_v17 = vsub.f32 %v394_v11, %v395_v14 }
  0x2d   : > { %324 = vmatpush.msrb.mxu0 %v249_v13  ;;  %p840_p8 = pneg %p839_p4 }
  0x2e   : > { %v227_v18 = vand.u32 4294901760, %v226_v15  ;;  %470 = vmatpush.msra.mxu2 %v395_v14  ;;  %v251_v19 = vand.u32 4294901760, %v250_v16  ;;  %v397_v20 = vand.u32 4294901760, %v396_v17 }
  0x2f   : > { %p845_p0 = pnand %p844_p13, %p840_p8 }
  0x30   : > { %228 = vmatmul.f32.vlgmr.msra.gmra.mxu0 %v227_v18  ;;  %252 = vmatpush.msra.mxu1 %v251_v19 }
  0x31   : > { %398 = vmatpush.msrb.mxu3 %v397_v20  ;;  %254 = vmatmul.f32.vlgmr.msra.gmra.mxu1 %v223_v6 }
  0x32   : > { %421 = vmatpush.msra.mxu0 %v394_v11  ;;  %346 = vmatpush.msrb.mxu1 %v221_v7 }
  0x33   : > { %492 = vmatpush.msra.mxu3 %v367_v8  ;;  %374 = vmatmul.f32.vlgmr.msrb.gmra.mxu2 %v227_v18 }
  0x34   : > { %400 = vmatmul.f32.vlgmr.msrb.gmra.mxu3 %v223_v6  ;;  %444 = vmatpush.msra.mxu1 %v367_v8 }
  0x38   : > { %326 = vmatmul.f32.vlgmr.msrb.gmra.mxu0 %v223_v6 }
  0x39   : > { %348 = vmatmul.f32.vlgmr.msrb.gmra.mxu1 %v223_v6 }
  0x3b   : > { %472 = vmatmul.f32.vlgmr.msra.gmra.mxu2 %v223_v6 }
  0x3c   : > { %494 = vmatmul.f32.vlgmr.msra.gmra.mxu3 %v223_v6 }
  0x40   : > { %424 = vmatmul.f32.vlgmr.msra.gmra.mxu0 %v224_v9 }
  0x41   : > { %448 = vmatmul.f32.vlgmr.msra.gmra.mxu1 %v225_v12 }
  0xad   : > { %v229_v21 = vpop.f32.mrf.mxu0 }
  0xae   : > { %v230_v22 = vadd.f32 2.0, %v229_v21  ;;  %v255_v23 = vpop.f32.mrf.mxu1  ;;  %v279_v24 = vpop.f32.mrf.mxu2 }
  0xaf   : > { %v303_v26 = vpop.f32.mrf.mxu3 }
  0xb0   : > { %v256_v25 = vadd.f32 %v255_v23, %v230_v22 }
  0xb2   : > { %v280_v27 = vadd.f32 %v279_v24, %v256_v25 }
  0xb4   : > { %v304_v28 = vadd.f32 %v303_v26, %v280_v27 }
  0xb5   : > { %v327_v29 = vpop.f32.mrf.mxu0 }
  0xb6   : > { %v328_v30 = vadd.f32 %v327_v29, %v304_v28  ;;  %v349_v31 = vpop.f32.mrf.mxu1  ;;  %v375_v32 = vpop.f32.mrf.mxu2 }
  0xb7   : > { %v376_v34 = vadd.f32 2.0, %v375_v32  ;;  %v401_v35 = vpop.f32.mrf.mxu3 }
  0xb8   : > { %v350_v33 = vadd.f32 %v349_v31, %v328_v30 }
  0xb9   : > { %v402_v36 = vadd.f32 %v401_v35, %v376_v34 }
  0xba   : > { %753 = vrsqrt.f32 %v350_v33  ;;  %vm504_vm2 = vweird.f32 %v350_v33 }
  0xbd   : > { %v425_v37 = vpop.f32.mrf.mxu0 }
  0xbe   : > { %v426_v38 = vadd.f32 %v425_v37, %v402_v36  ;;  %v449_v39 = vpop.f32.mrf.mxu1  ;;  %v473_v40 = vpop.f32.mrf.mxu2 }
  0xbf   : > { %v495_v44 = vpop.f32.mrf.mxu3 }
  0xc0   : > { %v754_v41 = vpop.eup %753  ;;  %v450_v42 = vadd.f32 %v449_v39, %v426_v38 }
  0xc1   : > { %v499_v43 = vmul.f32 %v754_v41, %v350_v33  ;;  %vm505_vm1 = vweird.f32 %v754_v41 }
  0xc2   : > { %v474_v45 = vadd.f32 %v473_v40, %v450_v42  ;;  %vm506_vm3 = vmor %vm504_vm2, %vm505_vm1 }
  0xc3   : > { %v500_v46 = vmul.f32 %v754_v41, %v499_v43 }
  0xc4   : > { %v496_v47 = vadd.f32 %v495_v44, %v474_v45 }
  0xc5   : > { %v501_v48 = vmul.f32 0.5, %v500_v46 }
  0xc6   : > { %755 = vrsqrt.f32 %v496_v47  ;;  %vm514_vm5 = vweird.f32 %v496_v47 }
  0xc7   : > { %v502_v49 = vsub.f32 1.5, %v501_v48 }
  0xc9   : > { %v503_v50 = vmul.f32 %v754_v41, %v502_v49 }
  0xcb   : > { %v507_v51 = vsel %vm506_vm3, %v754_v41, %v503_v50 }
  0xcc   : > { %v756_v52 = vpop.eup %755  ;;  %757 = vrsqrt.f32 %v507_v51  ;;  %vm525_vm7 = vcmp.eq.f32.partialorder %v507_v51, inf  ;;  %v528_v5 = vand.u32 2147483648, %v507_v51  ;;  %vm527_vm8 = vcmp.eq.f32.partialorder %v507_v51, 0.0 }
  0xcd   : > { %v509_v53 = vmul.f32 %v756_v52, %v496_v47  ;;  %vm515_vm4 = vweird.f32 %v756_v52 }
  0xce   : > { %vm516_vm6 = vmor %vm514_vm5, %vm515_vm4 }
  0xcf   : > { %v510_v54 = vmul.f32 %v756_v52, %v509_v53 }
  0xd1   : > { %v511_v55 = vmul.f32 0.5, %v510_v54 }
  0xd2   : > { %v758_v56 = vpop.eup %757 }
  0xd3   : > { %v519_v57 = vmul.f32 %v758_v56, %v507_v51  ;;  %v512_v58 = vsub.f32 1.5, %v511_v55 }
  0xd5   : > { %v520_v59 = vmul.f32 %v758_v56, %v519_v57  ;;  %v513_v60 = vmul.f32 %v756_v52, %v512_v58 }
  0xd7   : > { %v521_v61 = vmul.f32 0.5, %v520_v59  ;;  %v517_v62 = vsel %vm516_vm6, %v756_v52, %v513_v60 }
  0xd8   : > { %759 = vrsqrt.f32 %v517_v62  ;;  %vm537_vm9 = vcmp.eq.f32.partialorder %v517_v62, inf  ;;  %v540_v16 = vand.u32 2147483648, %v517_v62  ;;  %vm539_vm10 = vcmp.eq.f32.partialorder %v517_v62, 0.0 }
  0xd9   : > { %v522_v63 = vsub.f32 1.5, %v521_v61 }
  0xdb   : > { %v523_v1 = vmul.f32 %v758_v56, %v522_v63 }
  0xdd   : > { %v524_v3 = vmul.f32 %v523_v1, %v507_v51 }
  0xde   : > { %v760_v4 = vpop.eup %759 }
  0xdf   : > { %v531_v6 = vmul.f32 %v760_v4, %v517_v62  ;;  %v526_v7 = vsel %vm525_vm7, %v507_v51, %v524_v3 }
  0xe0   : > { %v529_v8 = vsel %vm527_vm8, %v528_v5, %v526_v7 }
  0xe1   : > { %v532_v9 = vmul.f32 %v760_v4, %v531_v6  ;;  %v542_v10 = vmul.f32 %v529_v8, %v507_v51 }
  0xe3   : > { %v533_v11 = vmul.f32 0.5, %v532_v9  ;;  %v544_v12 = vmul.f32 %v542_v10, %v1038_v0 }
  0xe5   : > { %v534_v13 = vsub.f32 1.5, %v533_v11  ;;  %546 = vst [vmem:[%s194_s17] sm:$0xff] %v544_v12 }
  0xe7   : > { %v535_v14 = vmul.f32 %v760_v4, %v534_v13 }
  0xe9   : > { %v536_v15 = vmul.f32 %v535_v14, %v517_v62 }
  0xeb   : > { %v538_v17 = vsel %vm537_vm9, %v517_v62, %v536_v15 }
  0xec   : > { %v541_v18 = vsel %vm539_vm10, %v540_v16, %v538_v17 }
  0xed   : > { %v543_v0 = vmul.f32 %v541_v18, %v517_v62 }
  0xef   : > { %v545_v19 = vmul.f32 %v543_v0, %v1040_v2 }
  0xf1   : > { %547 = vst [vmem:[%s194_s17 + $0x8] sm:$0xff] %v545_v19 }
  0xf2   : > { %848 = shalt.err (!%p845_p0)
}
  0xf3   : > { %686 = dma.vmem_to_hbm [thread:$0]  (%p1004_p5), %s565_s5, 256, %s567_s7, %s549_s12  }
  0xf4 PF: > { %s578_s25 = sand.u32 1, %s887_s9   ;;  %p697_p3 = pnand %p665_p9, %p974_p6 }
  0xf5   : > { %s579_s26 = scalar_lea.sflag [#allocation4], %s578_s25 }
  0xf6   : > { %p698_p7 = pneg %p697_p3 }
  0xf8   : > { %882 = dma.done.wait (%p698_p7), %s579_s26, 256  }
  0xf9   : > { %884 = vsyncadd (%p698_p7), %s579_s26, 4294967040  ;;  %s19_s14 = sadd.s32 1, %s907_s14   ;;  %s1098_s9 = smov %s891_s10 }
  0xfa   : > { %p16_p10 = scmp.ge.s32.totalorder %s19_s14, 4   ;;  %s1099_s10 = smov %s895_s11 }
  0xfb   : > { %s1100_s11 = smov %s1013_s6  ;;  %s1101_s12 = smov %s903_s13 }
  0xfc   : > { %s1102_s13 = smov %s1104_s27  ;;  %18 = sbr.rel (!%p16_p10) target bundleno = 7 (0x7), region = 77 }
 0x101   :  { %585 = vsyncpa [#allocation3], 1 }
 0x102   :  { %587 = vsyncpa [#allocation3 + $0x1], 1 }
 0x103   :  { %588 = vsyncpa [#allocation6], 1 }
 0x104   :  { %589 = vsyncpa [#allocation4], 1 }
 0x105   :  { %591 = vsyncpa [#allocation4 + $0x1], 1 }

</bundles_post_ra>
